<compile_context>
chip_gen: v6e
topology: v6e:2x2x1
jax: 0.10.0
libtpu: 0.0.40
codegen_flags: <defaults>
</compile_context>

<pallas_src>
import jax
import jax.numpy as jnp
import numpy as np
from jax.experimental import pallas as pl
from jax.experimental.pallas import tpu as pltpu


# ----------------------------- helpers --------------------------------------- #
def _round_up(a, b):
    return -(-a // b) * b


def _vmem_capacity_bytes():
    # Per-chip VMEM capacity (v5e/v6e: 128 MiB, v7x: 64 MiB per TC).
    try:
        return int(pltpu.get_tpu_info().vmem_capacity_bytes)
    except Exception:
        return 64 * 1024 * 1024  # conservative fallback (v7x per-core VMEM)


def _pick_tile_n(n, c, kc, m, out_bytes, budget_bytes):
    """Pick the largest lane-dense TILE_N that fits the VMEM budget.

    Corrected cost model (review item): double-buffered bf16 input tile,
    double-buffered output tile in its real dtype, and the actual f32
    intermediates (q twice, sim/att on the padded M axis, ctx, pre-cast out).
    """
    n128 = _round_up(max(n, 1), 128)
    m8 = max(8, _round_up(m, 8))
    best = 128
    for t in (128, 256, 512, 1024, 2048):
        if t > n128:
            break
        per = (2 * c * t * 2            # double-buffered bf16 x tile
               + 2 * c * t * out_bytes  # double-buffered output tile
               + 2 * kc * t * 4         # q (two ReLU stages)
               + 2 * m8 * t * 4         # sim / exp / att
               + kc * t * 4             # ctx
               + c * t * 4)             # f32 out before the bf16 cast
        if per <= budget_bytes:
            best = t
    return best


# ------------------- tiny per-batch key/value kernel ------------------------- #
def _proxy_kv_kernel(p_ref, w1_ref, b1_ref, wo2_ref, bo2_ref, k_ref, v_ref):
    f32, bf16 = jnp.float32, jnp.bfloat16
    kc = wo2_ref.shape[0]
    p = p_ref[...]                                                  # (C, M) bf16
    # Stacked f_object-conv1 + f_down: one MXU push instead of two tiny ones.
    h = jnp.maximum(jnp.dot(w1_ref[...], p, preferred_element_type=f32)
                    + b1_ref[...], 0.0)                             # (2K, M) f32
    v_ref[...] = h[kc:].astype(bf16)                                # value  (K, M)
    k1 = h[:kc].astype(bf16)
    k = jnp.maximum(jnp.dot(wo2_ref[...], k1, preferred_element_type=f32)
                    + bo2_ref[...], 0.0)                            # key (K, M)
    k_ref[...] = k.astype(bf16)


# -------------------------- main attention kernel ---------------------------- #
def _oab_attn_kernel(x_ref, kT_ref, v_ref, wp1_ref, wp2_ref, wu_ref, b_ref, o_ref):
    f32, bf16 = jnp.float32, jnp.bfloat16
    kc = wp1_ref.shape[0]

    b_all = b_ref[...]                              # (2K + C, 1) f32, packed
    bp1, bp2, bu = b_all[:kc], b_all[kc:2 * kc], b_all[2 * kc:]

    # ---- f_pixel: query from the current pixel tile ------------------------ #
    x = x_ref[...]                                  # (C, TILE_N) bf16
    q = jnp.maximum(jnp.dot(wp1_ref[...], x, preferred_element_type=f32) + bp1, 0.0)
    # key_channels**-0.5 is folded into wp2/bp2 (positive scale commutes w/ ReLU).
    q = jnp.maximum(jnp.dot(wp2_ref[...], q.astype(bf16),
                            preferred_element_type=f32) + bp2, 0.0)  # (K, TILE_N)

    # ---- attention: softmax over the (small) object axis M ------------------ #
    # key is resident and already transposed (M, K) -> plain MXU dot, no relayout.
    sim = jnp.dot(kT_ref[...], q.astype(bf16),
                  preferred_element_type=f32)                        # (M, TILE_N)
    sim = sim - jnp.max(sim, axis=0, keepdims=True)
    e = jnp.exp(sim)
    att = e * pl.reciprocal(jnp.sum(e, axis=0, keepdims=True), approx=True)

    ctx = jnp.dot(v_ref[...], att.astype(bf16),
                  preferred_element_type=f32)                        # (K, TILE_N)

    # ---- f_up: 1x1 conv + BN + ReLU -> (C, TILE_N), bf16 lane-dense store --- #
    out = jnp.maximum(jnp.dot(wu_ref[...], ctx.astype(bf16),
                              preferred_element_type=f32) + bu, 0.0)
    o_ref[...] = out.astype(o_ref.dtype)


# ----------------------------- parameter prep -------------------------------- #
def _prep_params(params, key_channels):
    """Fold conv+BN params into channels-first form.

    Returns (main-kernel params, proxy-kernel params):
      main : wp1 (K,C) bf16, wp2 (K,K) bf16 (K**-0.5 folded), wu (C,K) bf16,
             packed bias (2K+C, 1) f32  = [bp1; bp2*s; bu]
      proxy: w1 (2K,C) bf16 = [wo1; wd], b1 (2K,1) f32, wo2 (K,K) bf16, bo2 (K,1) f32
    """
    wp1, bp1, wp2, bp2, wo1, bo1, wo2, bo2, wd, bd, wu, bu = params
    s = key_channels ** -0.5
    f32, bf16 = jnp.float32, jnp.bfloat16
    wT = lambda w: jnp.asarray(w, f32).T.astype(bf16)   # (Cin,Cout) -> (Cout,Cin)
    col = lambda b: jnp.asarray(b, f32).reshape(-1, 1)

    main = (wT(wp1), wT(wp2 * s), wT(wu),
            jnp.concatenate([col(bp1), col(bp2 * s), col(bu)], axis=0))
    proxy = (jnp.concatenate([wT(wo1), wT(wd)], axis=0),
             jnp.concatenate([col(bo1), col(bd)], axis=0),
             wT(wo2), col(bo2))
    return main, proxy


# -------------------------------- wrapper ------------------------------------ #
def object_attention_block(x_nchw, proxy_nchw, params, key_channels, scale=1,
                           tile_n=None, out_dtype=jnp.bfloat16, input_buffers=2):
    # TODO(synk): scale > 1 path (MaxPool2d + bilinear align_corners interpolate)
    # is not implemented; only scale == 1 is supported.
    assert scale == 1
    bs, c, h, w = x_nchw.shape
    _, _, hp, wp = proxy_nchw.shape
    n, m = h * w, hp * wp
    kc = key_channels

    (m_wp1, m_wp2, m_wu, m_b), (p_w1, p_b1, p_wo2, p_bo2) = _prep_params(params, kc)

    # NCHW already has the spatial axis last after flattening H*W, so the
    # lane-dense (C, N)/(C, M) layout needs no boundary transpose.
    x = x_nchw.reshape(bs, c, n).astype(jnp.bfloat16)
    p = proxy_nchw.reshape(bs, c, m).astype(jnp.bfloat16)

    # ---- tiny per-batch key/value kernel (proxy path) ----------------------- #
    kv_w_specs = [pl.BlockSpec(a.shape, lambda b: (0, 0))
                  for a in (p_w1, p_b1, p_wo2, p_bo2)]
    k_obj, v_obj = pl.pallas_call(
        _proxy_kv_kernel,
        grid=(bs,),
        in_specs=[pl.BlockSpec((None, c, m), lambda b: (b, 0, 0))] + kv_w_specs,
        out_specs=(pl.BlockSpec((None, kc, m), lambda b: (b, 0, 0)),
                   pl.BlockSpec((None, kc, m), lambda b: (b, 0, 0))),
        out_shape=(jax.ShapeDtypeStruct((bs, kc, m), jnp.bfloat16),
                   jax.ShapeDtypeStruct((bs, kc, m), jnp.bfloat16)),
        compiler_params=pltpu.CompilerParams(dimension_semantics=("parallel",)),
    )(p, p_w1, p_b1, p_wo2, p_bo2)
    # Cache the key transposed so the per-tile sim matmul needs no relayout.
    k_t = jnp.swapaxes(k_obj, 1, 2)                      # (bs, M, K) bf16

    # ---- chip-derived VMEM budget + tile size + lane-dense padding ---------- #
    vmem_cap = _vmem_capacity_bytes()
    vmem_limit = int(vmem_cap) * 3 // 4                  # v6e/v5e: 96 MiB, v7x: 48 MiB
    out_bytes = jnp.dtype(out_dtype).itemsize
    if tile_n is None:
        tile_n = _pick_tile_n(n, c, kc, m, out_bytes,
                              vmem_limit - (4 << 20))    # headroom: weights/kv/scratch
    assert tile_n % 128 == 0
    n_pad = _round_up(n, tile_n)
    if n_pad != n:
        # Ragged H*W: pad the spatial axis; padded columns are independent
        # (softmax is over M per column) and are sliced off below.
        x = jnp.pad(x, ((0, 0), (0, 0), (0, n_pad - n)))
    n_tiles = n_pad // tile_n

    x_spec_kwargs = {}
    if input_buffers != 2:
        # v5e tuning knob: deeper pipelining on the x tile hides exposed DMA.
        x_spec_kwargs["pipeline_mode"] = pl.Buffered(input_buffers)

    in_specs = [
        pl.BlockSpec((None, c, tile_n), lambda b, t: (b, 0, t), **x_spec_kwargs),
        pl.BlockSpec((None, m, kc), lambda b, t: (b, 0, 0)),   # key^T, resident/batch
        pl.BlockSpec((None, kc, m), lambda b, t: (b, 0, 0)),   # value, resident/batch
        pl.BlockSpec(m_wp1.shape, lambda b, t: (0, 0)),
        pl.BlockSpec(m_wp2.shape, lambda b, t: (0, 0)),
        pl.BlockSpec(m_wu.shape, lambda b, t: (0, 0)),
        pl.BlockSpec(m_b.shape, lambda b, t: (0, 0)),          # packed biases
    ]
    out = pl.pallas_call(
        _oab_attn_kernel,
        grid=(bs, n_tiles),
        in_specs=in_specs,
        out_specs=pl.BlockSpec((None, c, tile_n), lambda b, t: (b, 0, t)),
        out_shape=jax.ShapeDtypeStruct((bs, c, n_pad), out_dtype),
        compiler_params=pltpu.CompilerParams(
            # No per-batch scratch carry anymore -> both axes parallel so v7x
            # megacore can shard the N axis as well as the batch axis.
            dimension_semantics=("parallel", "parallel"),
            vmem_limit_bytes=vmem_limit,
        ),
    )(x, k_t, v_obj, m_wp1, m_wp2, m_wu, m_b)

    if n_pad != n:
        out = out[:, :, :n]
    return out.reshape(bs, c, h, w)


# ----------------- parameter construction (deterministic) -------------------- #
def _fold_conv_bn(w, b, gamma, beta, mean, var, eps=1e-5):
    # y = relu(BN(x @ w + b)) folded to y = relu(x @ w_eff + b_eff)
    s = gamma / jnp.sqrt(var + eps)
    w_eff = w * s[None, :]
    b_eff = (b - mean) * s + beta
    return w_eff.astype(jnp.float32), b_eff.reshape(1, -1).astype(jnp.float32)


def make_conv_bn(key, cin, cout):
    ks = jax.random.split(key, 6)
    w = jax.random.normal(ks[0], (cin, cout), jnp.float32) / jnp.sqrt(float(cin))
    b = 0.1 * jax.random.normal(ks[1], (cout,), jnp.float32)
    gamma = 1.0 + 0.1 * jax.random.normal(ks[2], (cout,), jnp.float32)
    beta = 0.1 * jax.random.normal(ks[3], (cout,), jnp.float32)
    mean = 0.1 * jax.random.normal(ks[4], (cout,), jnp.float32)
    var = jax.random.uniform(ks[5], (cout,), jnp.float32, minval=0.5, maxval=1.5)
    return _fold_conv_bn(w, b, gamma, beta, mean, var)


# --------------------------- pure-JAX reference ------------------------------ #
def reference(x_nchw, proxy_nchw, params, key_channels):
    bs, c, h, w = x_nchw.shape
    wp1, bp1, wp2, bp2, wo1, bo1, wo2, bo2, wd, bd, wu, bu = params
    relu = lambda a: jnp.maximum(a, 0.0)
    x = jnp.transpose(x_nchw, (0, 2, 3, 1)).reshape(bs, -1, c)
    p = jnp.transpose(proxy_nchw, (0, 2, 3, 1)).reshape(bs, -1, c)
    q = relu(relu(x @ wp1 + bp1) @ wp2 + bp2)
    k = relu(relu(p @ wo1 + bo1) @ wo2 + bo2)
    v = relu(p @ wd + bd)
    sim = jnp.einsum("bnk,bmk->bnm", q, k) * key_channels ** -0.5
    sim = jax.nn.softmax(sim, axis=-1)
    ctx = jnp.einsum("bnm,bmk->bnk", sim, v)
    out = relu(ctx @ wu + bu)
    return jnp.transpose(out.reshape(bs, h, w, c), (0, 3, 1, 2))


# --------------------------------- main --------------------------------------- #
if __name__ == "__main__":
    key = jax.random.PRNGKey(0)
    bs, C, K = 2, 32, 16          # in_channels=32, key_channels=16
    H, W = 15, 17                 # N = 255: ragged -> exercises padded final tile
    Hp, Wp = 8, 1                 # proxy / object-region features (M = 8)

    keys = jax.random.split(key, 8)
    x = jax.random.normal(keys[0], (bs, C, H, W), jnp.float32)
    proxy = jax.random.normal(keys[1], (bs, C, Hp, Wp), jnp.float32)

    wp1, bp1 = make_conv_bn(keys[2], C, K)   # f_pixel conv1
    wp2, bp2 = make_conv_bn(keys[3], K, K)   # f_pixel conv2
    wo1, bo1 = make_conv_bn(keys[4], C, K)   # f_object conv1
    wo2, bo2 = make_conv_bn(keys[5], K, K)   # f_object conv2
    wd, bd = make_conv_bn(keys[6], C, K)     # f_down
    wu, bu = make_conv_bn(keys[7], K, C)     # f_up
    params = (wp1, bp1, wp2, bp2, wo1, bo1, wo2, bo2, wd, bd, wu, bu)

    # tile_n=128 at this toy size so the multi-N-tile + ragged-padding path is
    # exercised; production sizes auto-pick 512-2048 from the chip VMEM budget.
    out = object_attention_block(x, proxy, params, key_channels=K, scale=1,
                                 tile_n=128)
    out = jax.block_until_ready(out)

    ref = reference(x, proxy, params, K)
    assert out.shape == (bs, C, H, W)
    # bf16 MXU operands + bf16 output + approx reciprocal vs f32 reference.
    np.testing.assert_allclose(np.asarray(jnp.asarray(out, jnp.float32)),
                               np.asarray(ref), rtol=3e-2, atol=5e-2)
    print("KERNEL_OK")
</pallas_src>

<mosaic_0001>
module attributes {stable_mosaic.version = 11 : i64} {
  func.func @_proxy_kv_kernel(%arg0: i32, %arg1: memref<1x32x8xbf16, #tpu.memory_space<vmem>>, %arg2: memref<32x32xbf16, #tpu.memory_space<vmem>>, %arg3: memref<32x1xf32, #tpu.memory_space<vmem>>, %arg4: memref<16x16xbf16, #tpu.memory_space<vmem>>, %arg5: memref<16x1xf32, #tpu.memory_space<vmem>>, %arg6: memref<1x16x8xbf16, #tpu.memory_space<vmem>>, %arg7: memref<1x16x8xbf16, #tpu.memory_space<vmem>>) attributes {dimension_semantics = [#tpu.dimension_semantics<parallel>], iteration_bounds = array<i64: 2>, scalar_prefetch = 0 : i64, scratch_operands = 0 : i64, tpu.core_type = #tpu.core_type<tc>, window_params = [{transform_indices = @transform_0, window_bounds = array<i64: 1, 32, 8>}, {pipeline_mode = #tpu.pipeline_mode<synchronous>, transform_indices = @transform_1, window_bounds = array<i64: 32, 32>}, {pipeline_mode = #tpu.pipeline_mode<synchronous>, transform_indices = @transform_2, window_bounds = array<i64: 32, 1>}, {pipeline_mode = #tpu.pipeline_mode<synchronous>, transform_indices = @transform_3, window_bounds = array<i64: 16, 16>}, {pipeline_mode = #tpu.pipeline_mode<synchronous>, transform_indices = @transform_4, window_bounds = array<i64: 16, 1>}, {transform_indices = @transform_5, window_bounds = array<i64: 1, 16, 8>}, {transform_indices = @transform_6, window_bounds = array<i64: 1, 16, 8>}]} {
    %c0 = arith.constant 0 : index
    %c0_0 = arith.constant 0 : index
    %c0_1 = arith.constant 0 : index
    %0 = vector.load %arg1[%c0, %c0_0, %c0_1] : memref<1x32x8xbf16, #tpu.memory_space<vmem>>, vector<1x32x8xbf16>
    %1 = vector.shape_cast %0 : vector<1x32x8xbf16> to vector<32x8xbf16>
    %c0_2 = arith.constant 0 : index
    %c0_3 = arith.constant 0 : index
    %2 = vector.load %arg2[%c0_2, %c0_3] : memref<32x32xbf16, #tpu.memory_space<vmem>>, vector<32x32xbf16>
    %cst = arith.constant dense<0.000000e+00> : vector<32x8xf32>
    %3 = tpu.matmul %2, %1, %cst {dimension_numbers = #tpu.dot_dimension_numbers<[1], [0], [0], [1], [0, 0, 1, 1], [], []>} : vector<32x32xbf16>, vector<32x8xbf16>, vector<32x8xf32> -> vector<32x8xf32>
    %c0_4 = arith.constant 0 : index
    %c0_5 = arith.constant 0 : index
    %4 = vector.load %arg3[%c0_4, %c0_5] : memref<32x1xf32, #tpu.memory_space<vmem>>, vector<32x1xf32>
    %5 = vector.broadcast %4 : vector<32x1xf32> to vector<32x8xf32>
    %6 = arith.addf %3, %5 : vector<32x8xf32>
    %cst_6 = arith.constant 0.000000e+00 : f32
    %7 = vector.broadcast %cst_6 : f32 to vector<32x8xf32>
    %8 = arith.maximumf %6, %7 : vector<32x8xf32>
    %9 = vector.extract_strided_slice %8 {offsets = [16, 0], sizes = [16, 8], strides = [1, 1]} : vector<32x8xf32> to vector<16x8xf32>
    %10 = arith.truncf %9 : vector<16x8xf32> to vector<16x8xbf16>
    %c0_7 = arith.constant 0 : index
    %c0_8 = arith.constant 0 : index
    %c0_9 = arith.constant 0 : index
    %11 = vector.load %arg7[%c0_7, %c0_8, %c0_9] : memref<1x16x8xbf16, #tpu.memory_space<vmem>>, vector<1x16x8xbf16>
    %12 = vector.shape_cast %11 : vector<1x16x8xbf16> to vector<16x8xbf16>
    %13 = vector.shape_cast %10 : vector<16x8xbf16> to vector<1x16x8xbf16>
    tpu.vector_store %arg7[%c0_7, %c0_8, %c0_9], %13 {strides = array<i32>} : memref<1x16x8xbf16, #tpu.memory_space<vmem>>, vector<1x16x8xbf16>,
    %14 = vector.extract_strided_slice %8 {offsets = [0, 0], sizes = [16, 8], strides = [1, 1]} : vector<32x8xf32> to vector<16x8xf32>
    %15 = arith.truncf %14 : vector<16x8xf32> to vector<16x8xbf16>
    %c0_10 = arith.constant 0 : index
    %c0_11 = arith.constant 0 : index
    %16 = vector.load %arg4[%c0_10, %c0_11] : memref<16x16xbf16, #tpu.memory_space<vmem>>, vector<16x16xbf16>
    %cst_12 = arith.constant dense<0.000000e+00> : vector<16x8xf32>
    %17 = tpu.matmul %16, %15, %cst_12 {dimension_numbers = #tpu.dot_dimension_numbers<[1], [0], [0], [1], [0, 0, 1, 1], [], []>} : vector<16x16xbf16>, vector<16x8xbf16>, vector<16x8xf32> -> vector<16x8xf32>
    %c0_13 = arith.constant 0 : index
    %c0_14 = arith.constant 0 : index
    %18 = vector.load %arg5[%c0_13, %c0_14] : memref<16x1xf32, #tpu.memory_space<vmem>>, vector<16x1xf32>
    %19 = vector.broadcast %18 : vector<16x1xf32> to vector<16x8xf32>
    %20 = arith.addf %17, %19 : vector<16x8xf32>
    %cst_15 = arith.constant 0.000000e+00 : f32
    %21 = vector.broadcast %cst_15 : f32 to vector<16x8xf32>
    %22 = arith.maximumf %20, %21 : vector<16x8xf32>
    %23 = arith.truncf %22 : vector<16x8xf32> to vector<16x8xbf16>
    %c0_16 = arith.constant 0 : index
    %c0_17 = arith.constant 0 : index
    %c0_18 = arith.constant 0 : index
    %24 = vector.load %arg6[%c0_16, %c0_17, %c0_18] : memref<1x16x8xbf16, #tpu.memory_space<vmem>>, vector<1x16x8xbf16>
    %25 = vector.shape_cast %24 : vector<1x16x8xbf16> to vector<16x8xbf16>
    %26 = vector.shape_cast %23 : vector<16x8xbf16> to vector<1x16x8xbf16>
    tpu.vector_store %arg6[%c0_16, %c0_17, %c0_18], %26 {strides = array<i32>} : memref<1x16x8xbf16, #tpu.memory_space<vmem>>, vector<1x16x8xbf16>,
    return
  }
  func.func @transform_0(%arg0: i32) -> (i32, i32, i32) {
    %c0_i32 = arith.constant 0 : i32
    %c0_i32_0 = arith.constant 0 : i32
    %c0_i32_1 = arith.constant 0 : i32
    return %arg0, %c0_i32, %c0_i32_0 : i32, i32, i32
  }
  func.func @transform_1(%arg0: i32) -> (i32, i32) {
    %c0_i32 = arith.constant 0 : i32
    %c0_i32_0 = arith.constant 0 : i32
    %c0_i32_1 = arith.constant 0 : i32
    return %c0_i32, %c0_i32_0 : i32, i32
  }
  func.func @transform_2(%arg0: i32) -> (i32, i32) {
    %c0_i32 = arith.constant 0 : i32
    %c0_i32_0 = arith.constant 0 : i32
    %c0_i32_1 = arith.constant 0 : i32
    return %c0_i32, %c0_i32_0 : i32, i32
  }
  func.func @transform_3(%arg0: i32) -> (i32, i32) {
    %c0_i32 = arith.constant 0 : i32
    %c0_i32_0 = arith.constant 0 : i32
    %c0_i32_1 = arith.constant 0 : i32
    return %c0_i32, %c0_i32_0 : i32, i32
  }
  func.func @transform_4(%arg0: i32) -> (i32, i32) {
    %c0_i32 = arith.constant 0 : i32
    %c0_i32_0 = arith.constant 0 : i32
    %c0_i32_1 = arith.constant 0 : i32
    return %c0_i32, %c0_i32_0 : i32, i32
  }
  func.func @transform_5(%arg0: i32) -> (i32, i32, i32) {
    %c0_i32 = arith.constant 0 : i32
    %c0_i32_0 = arith.constant 0 : i32
    %c0_i32_1 = arith.constant 0 : i32
    return %arg0, %c0_i32, %c0_i32_0 : i32, i32, i32
  }
  func.func @transform_6(%arg0: i32) -> (i32, i32, i32) {
    %c0_i32 = arith.constant 0 : i32
    %c0_i32_0 = arith.constant 0 : i32
    %c0_i32_1 = arith.constant 0 : i32
    return %arg0, %c0_i32, %c0_i32_0 : i32, i32, i32
  }
}

</mosaic_0001>

<bundles_post_ra>
// kernel: tpu_custom_call.1
= control target key start
LH: loop header
LB: loop body
LE: loop exit
PB: predicated region body
PF: predicated region fallthrough
CT: control target
= control target key end

     0   :  { %s672_s21 = smov 0   ;;  %s733_s0 = inlined_call_operand.vmem [shape: bf16[2,32,8], index: 0, kind: input, shape index: {}]   ;;  %s734_s1 = inlined_call_operand.vmem [shape: bf16[32,32], index: 1, kind: input, shape index: {}]   ;;  %s735_s2 = inlined_call_operand.vmem [shape: f32[32,1], index: 2, kind: input, shape index: {}]   ;;  %s736_s3 = inlined_call_operand.vmem [shape: bf16[16,16], index: 3, kind: input, shape index: {}]   ;;  %s737_s4 = inlined_call_operand.vmem [shape: f32[16,1], index: 4, kind: input, shape index: {}]   ;;  %s738_s5 = inlined_call_operand.vmem [shape: bf16[2,16,8], index: 5, kind: output, shape index: {0}]   ;;  %s739_s6 = inlined_call_operand.vmem [shape: bf16[2,16,8], index: 6, kind: output, shape index: {1}]  }
   0x1 LB: > { %s556_s22 = sadd.s32 4294967295, %s632_s21   ;;  %p560_p0 = scmp.ge.s32.totalorder %s632_s21, 1  ;;  %s632_s21 = sphi %s672_s21, %s17_s21  }
   0x2   : > { %p215_p1 = scmp.lt.s32.totalorder %s632_s21, 3 }
   0x4   : > { %p216_p2 = pnand %p560_p0, %p215_p1 }
   0x5   : > { %p250_p3 = scmp.lt.s32.totalorder (!%p216_p2), %s556_s22, 1 }
   0x6   : > { %219 = sbr.rel (%p216_p2) target bundleno = 435 (0x1b3), region = 40 }
   0xb   : > { %v623_v0 = vld [vmem:[%s734_s1] sm:$0xff]   ;;  %vm320_vm0 = vcmask 261120   ;;  %s741_s22 = smov (!%p250_p3, %s556_s22), 1  ;;  %v276_v2 = vld [vmem:[%s735_s2 + $0x10] sm:$0xff]  ;;  %v634_v3 = vmov 0   ;;  %v275_v4 = vld [vmem:[%s735_s2 + $0x8] sm:$0xff] }
   0xc   : > { %598 = vmatprep.mubr.msk.bf16.mxu0 %vm320_vm0, %v623_v0  ;;  %v274_v1 = vld [vmem:[%s735_s2] sm:$0xff]  ;;  %619 = vset.pattern.permute.xlu0 %v634_v3  ;;  %s581_s29 = sshll.u32 %s741_s22, 4  ;;  %v277_v5 = vld [vmem:[%s735_s2 + $0x18] sm:$0xff]  ;;  %v624_v9 = vld [vmem:[%s734_s1 + $0x8] sm:$0xff]   ;;  %v635_v10 = vmov 0.0   ;;  %vm636_vm1 = vmmov 0  }
   0xd   : > { %620 = vset.pattern.permute.xlu1 %v634_v3  ;;  %280 = vperm.xlu0 %619, %v274_v1   ;;  %s254_s8 = scalar_lea.vmem %s733_s0, %s581_s29  ;;  %v394_v8 = vld [vmem:[%s737_s4] sm:$0xff]  ;;  %v395_v11 = vld [vmem:[%s737_s4 + $0x8] sm:$0xff]  ;;  %s582_s19 = sshll.u32 %s741_s22, 3  ;;  %vm388_vm2 = vcmask 60416   ;;  %vm411_vm3 = vcmask 130048  }
   0xe   : > { %290 = vperm.xlu1 %620, %v276_v2   ;;  %v621_v6 = vld [vmem:[%s254_s8 + $0x8] sm:$0xff]   ;;  %v622_v7 = vld [vmem:[%s254_s8] sm:$0xff]   ;;  %602 = vmatprep.subr.bf16.mxu1 %v635_v10  ;;  %s264_s24 = scalar_lea.vmem %s739_s6, %s582_s19  ;;  %s259_s29 = scalar_lea.vmem %s738_s5, %s582_s19 }
   0xf   : > { %594 = vmatprep.subr.bf16.mxu0 %v621_v6  ;;  %604 = vmatprep.mubr.msk.bf16.mxu1 %vm636_vm1, %v635_v10  ;;  %v625_v31 = vld [vmem:[%s736_s3] sm:$0xff]  }
  0x10   : > { %595 = vmatpush3.bf16.msra.mxu0 %v621_v6 }
  0x11   : > { %285 = vperm.xlu0 %619, %v275_v4   ;;  %596 = vmatprep.subr.bf16.mxu0 %v622_v7 }
  0x12   : > { %295 = vperm.xlu1 %620, %v277_v5  }
  0x14   : > { %597 = vmatpush3.bf16.msra.mxu0 %v622_v7 }
  0x15   : > { %398 = vperm.xlu0 %619, %v394_v8  }
  0x16   : > { %403 = vperm.xlu1 %620, %v395_v11  }
  0x17   : > { %599 = vmatmul.mubr.msk.bf16.vlgmr.msra.gmra.mxu0 %vm320_vm0, %v624_v9 }
  0x88   : > { %v281_v13 = vpop.permute.xlu0 %280 }
  0x89   : > { %v291_v12 = vpop.permute.xlu1 %290 }
  0x8c   : > { %v286_v23 = vpop.permute.xlu0 %285 }
  0x8d   : > { %v296_v17 = vpop.permute.xlu1 %295 }
  0x90   : > { %v399_v32 = vpop.permute.xlu0 %398 }
  0x91   : > { %v404_v37 = vpop.permute.xlu1 %403 }
  0xd7   : > { %v600_v14 = vpop.f32.mrf.mxu0 }
  0xd8   : > { %v370_v15 = vadd.f32 %v600_v14, %v291_v12 }
  0xd9   : > { %v361_v16 = vpop.f32.mrf.mxu0 }
  0xda   : > { %v378_v18 = vmax.f32 %v370_v15, 0.0  ;;  %v362_v21 = vadd.f32 %v361_v16, %v281_v13 }
  0xdb   : > { %v601_v19 = vpop.f32.mrf.mxu0 }
  0xdc   : > { %v584_v20 = vpack.c.bf16 %v378_v18, %v378_v18  ;;  %v373_v22 = vadd.f32 %v601_v19, %v296_v17  ;;  %v376_v27 = vmax.f32 %v362_v21, 0.0 }
  0xdd   : > { %v364_v24 = vpop.f32.mrf.mxu0 }
  0xde   : > { %389 = vst.msk [vmem:[%s264_s24] sm:$0xf] %vm388_vm2, %v584_v20  ;;  %v379_v25 = vmax.f32 %v373_v22, 0.0  ;;  %v365_v26 = vadd.f32 %v364_v24, %v286_v23 }
  0xe0   : > { %v585_v28 = vpack.c.bf16 %v379_v25, %v379_v25  ;;  %v377_v29 = vmax.f32 %v365_v26, 0.0 }
  0xe2   : > { %390 = vst.msk [vmem:[%s264_s24 + $0x4] sm:$0xf] %vm388_vm2, %v585_v28  ;;  %v391_v30 = vpack.c.bf16 %v377_v29, %v376_v27 }
  0xe4   : > { %603 = vmatpush3.bf16.msra.mxu1 %v391_v30 }
  0xe7   : > { %605 = vmatmul.mubr.msk.bf16.vlgmr.msra.gmra.mxu1 %vm411_vm3, %v625_v31 }
 0x1a7   : > { %v449_v33 = vpop.f32.mrf.mxu1 }
 0x1a8   : > { %v450_v34 = vadd.f32 %v449_v33, %v399_v32 }
 0x1a9   : > { %v606_v35 = vpop.f32.mrf.mxu1 }
 0x1aa   : > { %v456_v36 = vmax.f32 %v450_v34, 0.0 }
 0x1ab   : > { %v452_v38 = vpop.f32.mrf.mxu1 }
 0x1ac   : > { %v586_v39 = vpack.c.bf16 %v456_v36, %v456_v36  ;;  %v453_v40 = vadd.f32 %v452_v38, %v404_v37 }
 0x1ad   : > { %v607_v41 = vpop.f32.mrf.mxu1 }
 0x1ae   : > { %466 = vst.msk [vmem:[%s259_s29] sm:$0xf] %vm388_vm2, %v586_v39  ;;  %v457_v42 = vmax.f32 %v453_v40, 0.0 }
 0x1b0   : > { %v587_v43 = vpack.c.bf16 %v457_v42, %v457_v42 }
 0x1b2   : > { %467 = vst.msk [vmem:[%s259_s29 + $0x4] sm:$0xf] %vm388_vm2, %v587_v43 }
 0x1b3 PF: > { %s17_s21 = sadd.s32 1, %s632_s21  }
 0x1b4   : > { %p14_p4 = scmp.ge.s32.totalorder %s17_s21, 4  }
 0x1b6   :  { %16 = sbr.rel (!%p14_p4) target bundleno = 1 (0x1), region = 82 }

</bundles_post_ra>
